<compile_context>
chip_gen: v6e
topology: v6e:2x2x1
jax: 0.10.0
libtpu: 0.0.40
codegen_flags: <defaults>
</compile_context>

<pallas_src>
import functools

import jax
import jax.numpy as jnp
import numpy as np
from jax import lax
from jax.experimental import pallas as pl
from jax.experimental.pallas import tpu as pltpu

_MIB = 1024 * 1024


# ----------------------------------------------------------------------------
# Tiling / VMEM helpers
# ----------------------------------------------------------------------------
def _pick_lane_tile(n, target):
    """Largest lane tile <= target that divides n (multiple of 128), else n."""
    if n <= target:
        return n
    t = (target // 128) * 128
    while t >= 128:
        if n % t == 0:
            return t
        t -= 128
    return n  # no 128-multiple divisor found -> fall back to the full axis


def _pick_batch_tile(b, per_elem_bytes, budget=8 * _MIB):
    """Largest divisor of b whose per-step footprint stays under `budget`."""
    bt = max(1, min(b, budget // max(1, per_elem_bytes)))
    while b % bt:
        bt -= 1
    return bt


def _vmem_limit(estimate_bytes):
    # Explicit scoped-VMEM budget (don't rely on the default: 32 MiB scoped /
    # 64 MiB physical on v7x).  Clamp to [32, 64] MiB.
    return int(min(64 * _MIB, max(32 * _MIB, estimate_bytes)))


# ----------------------------------------------------------------------------
# Kernel 1: online feature softmax + bilinear matmul + bilinear softmax (+ssum)
# ----------------------------------------------------------------------------
def _bilinear_kernel(scale, f_ref, bnorm_ref, ssum_ref,
                     m_sc, l_sc, fsum_sc, acc_sc):
    """grid=(B, N//TN).  f_ref: (1,C,TN) bf16 -> bnorm (1,C,C), ssum (1,C,1).

    Per-batch running state (row max / denom / rowsum(f) / un-normalised
    bilinear accumulator) lives in VMEM scratch; outputs are produced on the
    last N-chunk only (standard accumulator pattern, N axis = "arbitrary").
    """
    k = pl.program_id(1)

    @pl.when(k == 0)
    def _():
        m_sc[...] = jnp.full_like(m_sc, -jnp.inf)
        l_sc[...] = jnp.zeros_like(l_sc)
        fsum_sc[...] = jnp.zeros_like(fsum_sc)
        acc_sc[...] = jnp.zeros_like(acc_sc)

    f_bf = f_ref[0]                                   # (C, TN) bf16
    f32 = f_bf.astype(jnp.float32)
    # Softmax math stays f32 (v5e-safe; EUP/VPU bf16 exp is a v6e/v7x-only
    # micro-opt we deliberately skip for fidelity).
    z = f32 * scale

    m_prev = m_sc[...]                                # (C, 1)
    m_new = jnp.maximum(m_prev, jnp.max(z, axis=-1, keepdims=True))
    alpha = jnp.exp(m_prev - m_new)                   # (C, 1)
    p = jnp.exp(z - m_new)                            # (C, TN) f32

    l_sc[...] = alpha * l_sc[...] + jnp.sum(p, axis=-1, keepdims=True)
    fsum_sc[...] = fsum_sc[...] + jnp.sum(f32, axis=-1, keepdims=True)
    # Un-normalised bilinear accumulator: exp(z - m) @ f^T (bf16 MXU, f32 acc).
    acc_sc[...] = alpha * acc_sc[...] + lax.dot_general(
        p.astype(jnp.bfloat16), f_bf,
        dimension_numbers=(((1,), (1,)), ((), ())),
        preferred_element_type=jnp.float32)
    m_sc[...] = m_new

    @pl.when(k == pl.num_programs(1) - 1)
    def _():
        # Finish softmax #1 (divide by running denominator) -> exact bilinear,
        # then softmax #2 over channels.  Exact divides (not approx recip) to
        # stay close to the f32 PyTorch reference.
        bil = acc_sc[...] / l_sc[...]                 # (C, C)
        bil = bil - jnp.max(bil, axis=-1, keepdims=True)
        be = jnp.exp(bil)
        bnorm = be / jnp.sum(be, axis=-1, keepdims=True)
        bnorm_ref[0] = bnorm
        # structure_att (pre-sort): sum_n (bnorm @ f) == bnorm @ rowsum(f),
        # so `tri` never needs to exist; exact duplicate channels stay exact.
        ssum_ref[0] = jnp.dot(bnorm, fsum_sc[...],
                              preferred_element_type=jnp.float32)


# ----------------------------------------------------------------------------
# Kernel 2: streaming masked channel combination  img_chunk = w @ f_chunk
# ----------------------------------------------------------------------------
def _mask_matvec_kernel(w_ref, f_ref, img_ref):
    """w: (1,1,C) f32, f: (1,C,TN) bf16 -> img: (1,1,TN) f32."""
    # Purely HBM-bound matvec over f; MXU utilisation is irrelevant here.
    # TODO(synk): on v5e, pipeline_mode=pl.Buffered(3) on the f BlockSpec hides
    # the exposed DMA tail (skipped here to keep one code path).
    img_ref[0] = jnp.dot(w_ref[0], f_ref[0].astype(jnp.float32),
                         preferred_element_type=jnp.float32)


# ----------------------------------------------------------------------------
# Kernel 3: separable bilinear resize + square, whole batch block per step
# ----------------------------------------------------------------------------
def _resize_square_kernel(img_ref, wr_ref, wct_ref, out_ref):
    """img: (Bt,H,W), wr: (ORI,H), wct: (W,ORI) -> out: (Bt,ORI,ORI)."""
    img = img_ref[...]                                # (Bt, H, W) f32
    bt = img.shape[0]
    wct_b = jnp.broadcast_to(wct_ref[...][None], (bt,) + wct_ref.shape)
    wr_b = jnp.broadcast_to(wr_ref[...][None], (bt,) + wr_ref.shape)
    t = jnp.einsum('bhw,bwo->bho', img, wct_b,
                   preferred_element_type=jnp.float32)       # (Bt, H, ORI)
    o = jnp.einsum('brh,bho->bro', wr_b, t,
                   preferred_element_type=jnp.float32)       # (Bt, ORI, ORI)
    out_ref[...] = o * o


# ----------------------------------------------------------------------------
# Deterministic constants: 1-D bilinear interp weights (align_corners=False),
# built once in numpy (no per-call scatter ops in the traced graph).
# ----------------------------------------------------------------------------
@functools.lru_cache(maxsize=None)
def _interp_weight_np(in_size, out_size):
    scale = in_size / out_size
    dst = np.arange(out_size, dtype=np.float64)
    src = np.maximum(scale * (dst + 0.5) - 0.5, 0.0)
    i0 = np.minimum(np.floor(src).astype(np.int64), in_size - 1)
    i1 = np.minimum(i0 + 1, in_size - 1)
    l1 = (src - i0).astype(np.float32)
    l0 = np.float32(1.0) - l1
    w = np.zeros((out_size, in_size), np.float32)
    rows = np.arange(out_size)
    np.add.at(w, (rows, i0), l0)
    np.add.at(w, (rows, i1), l1)
    return w                                          # (out_size, in_size)


# ----------------------------------------------------------------------------
# Forward wrapper
# ----------------------------------------------------------------------------
def trilinear_att_forward(feature_maps, ori_size, scale=5):
    B, C, H, W = feature_maps.shape
    N = H * W

    # Stream f in bf16 (halves HBM traffic of K1/K2 and double-buffered VMEM).
    f = feature_maps.reshape(B, C, N).astype(jnp.bfloat16)

    # ---- K1: online-softmax bilinear + second softmax + ssum ----------------
    # TODO(synk): for tiny C (<=64) several batch elements per step / C padded
    # to a 128 multiple would fill the MXU better; single-batch rows kept here.
    tn1 = _pick_lane_tile(N, max(512, (2 * _MIB) // max(1, 2 * C)))
    k1_vmem = _vmem_limit(
        2 * C * tn1 * 2          # double-buffered bf16 f chunk
        + 4 * C * tn1 * 4        # f32 temporaries (upcast, z, p, ...)
        + 3 * C * C * 4          # acc scratch + double-buffered bnorm output
        + 4 * C * 4 + (2 * _MIB))
    bnorm, ssum = pl.pallas_call(
        functools.partial(_bilinear_kernel, float(scale)),
        out_shape=(jax.ShapeDtypeStruct((B, C, C), jnp.float32),
                   jax.ShapeDtypeStruct((B, C, 1), jnp.float32)),
        grid=(B, N // tn1),
        in_specs=[pl.BlockSpec((1, C, tn1), lambda b, k: (b, 0, k))],
        out_specs=(pl.BlockSpec((1, C, C), lambda b, k: (b, 0, 0)),
                   pl.BlockSpec((1, C, 1), lambda b, k: (b, 0, 0))),
        scratch_shapes=[pltpu.VMEM((C, 1), jnp.float32),    # running max
                        pltpu.VMEM((C, 1), jnp.float32),    # running denom
                        pltpu.VMEM((C, 1), jnp.float32),    # rowsum(f)
                        pltpu.VMEM((C, C), jnp.float32)],   # bilinear accum
        compiler_params=pltpu.CompilerParams(
            dimension_semantics=("parallel", "arbitrary"),
            vmem_limit_bytes=k1_vmem),
    )(f)

    # ---- glue: sort + duplicate-detection mask, exactly as in PyTorch -------
    # TODO(synk): torch.sort / duplicate-mask construction stays in plain JAX
    # (no sort primitive in Mosaic).  The reference applies the sorted-order
    # mask at ORIGINAL channel positions (no unsort) — reproduced verbatim.
    s = ssum[:, :, 0]                                 # (B, C)
    s_sorted = jnp.sort(s, axis=1)
    neq = s_sorted[:, 1:] != s_sorted[:, :-1]
    mask = jnp.concatenate([jnp.ones((B, 1), dtype=bool), neq], axis=1)
    mask = mask.astype(jnp.float32)                   # (B, C)
    # Hoist the tiny (1,C) @ (C,C) product out of K2: w = mask @ bnorm.
    w = jnp.einsum('bc,bck->bk', mask, bnorm)[:, None, :]   # (B, 1, C)

    # ---- K2: img = w @ f, streamed in lane-dense N chunks -------------------
    tn2 = _pick_lane_tile(N, max(512, (4 * _MIB) // max(1, 2 * C)))
    k2_vmem = _vmem_limit(2 * C * tn2 * 2 + 2 * C * tn2 * 4
                          + 2 * tn2 * 4 + (2 * _MIB))
    img = pl.pallas_call(
        _mask_matvec_kernel,
        out_shape=jax.ShapeDtypeStruct((B, 1, N), jnp.float32),
        grid=(B, N // tn2),
        in_specs=[pl.BlockSpec((1, 1, C), lambda b, k: (b, 0, 0)),
                  pl.BlockSpec((1, C, tn2), lambda b, k: (b, 0, k))],
        out_specs=pl.BlockSpec((1, 1, tn2), lambda b, k: (b, 0, k)),
        compiler_params=pltpu.CompilerParams(
            dimension_semantics=("parallel", "parallel"),
            vmem_limit_bytes=k2_vmem),
    )(w, f)

    # Free metadata reshape in HBM (avoids an in-kernel lane->sublane relayout).
    img_hw = img.reshape(B, H, W)

    # Separable interpolation weights (tiny, constant index_map => resident).
    wr = jnp.asarray(_interp_weight_np(H, ori_size))          # (ori, H)
    wct = jnp.asarray(_interp_weight_np(W, ori_size).T)       # (W, ori)

    # ---- K3: out = (Wr @ img_hw @ Wc^T) ** 2, batch folded into one step ----
    bt = _pick_batch_tile(B, 4 * (ori_size * ori_size + H * W
                                  + H * ori_size))
    out = pl.pallas_call(
        _resize_square_kernel,
        out_shape=jax.ShapeDtypeStruct((B, ori_size, ori_size), jnp.float32),
        grid=(B // bt,),
        in_specs=[pl.BlockSpec((bt, H, W), lambda i: (i, 0, 0)),
                  pl.BlockSpec((ori_size, H), lambda i: (0, 0)),
                  pl.BlockSpec((W, ori_size), lambda i: (0, 0))],
        out_specs=pl.BlockSpec((bt, ori_size, ori_size), lambda i: (i, 0, 0)),
        compiler_params=pltpu.CompilerParams(
            dimension_semantics=("parallel",)),
    )(img_hw, wr, wct)

    return out                                        # (B, ori, ori)


# ----------------------------------------------------------------------------
# Pure-JAX reference (f32) for a loose correctness check
# ----------------------------------------------------------------------------
def _reference_forward(x, ori_size, scale):
    B, C, H, W = x.shape
    f = x.reshape(B, C, H * W).astype(jnp.float32)
    fnorm = jax.nn.softmax(f * scale, axis=2)
    bil = jax.nn.softmax(jnp.einsum('bcn,bkn->bck', fnorm, f), axis=2)
    tri = jnp.einsum('bck,bkn->bcn', bil, f)
    ssum = jnp.sum(tri, axis=2)
    s_sorted = jnp.sort(ssum, axis=1)
    neq = s_sorted[:, 1:] != s_sorted[:, :-1]
    mask = jnp.concatenate([jnp.ones((B, 1), dtype=bool), neq],
                           axis=1).astype(jnp.float32)
    img = jnp.einsum('bc,bcn->bn', mask, tri).reshape(B, H, W)
    wr = jnp.asarray(_interp_weight_np(H, ori_size))
    wc = jnp.asarray(_interp_weight_np(W, ori_size))
    out = jnp.einsum('rh,bhw,ow->bro', wr, img, wc)
    return out * out


if __name__ == "__main__":
    key = jax.random.PRNGKey(0)
    B, C, H, W = 2, 4, 16, 16
    ori_size = 32

    x = jax.random.normal(key, (B, C, H, W), dtype=jnp.float32)
    y = trilinear_att_forward(x, ori_size=ori_size, scale=5)
    jax.block_until_ready(y)

    assert y.shape == (B, ori_size, ori_size)
    assert bool(jnp.all(jnp.isfinite(y)))

    # Loose check vs f32 reference (kernel streams f in bf16 -> small drift).
    ref = _reference_forward(x, ori_size, 5)
    rel_err = float(jnp.max(jnp.abs(y - ref)) / (jnp.max(jnp.abs(ref)) + 1e-6))
    assert rel_err < 5e-2, f"max relative error too large: {rel_err}"

    print("KERNEL_OK")
</pallas_src>

<mosaic_0001>
module attributes {stable_mosaic.version = 11 : i64} {
  func.func @_bilinear_kernel(%arg0: i32, %arg1: i32, %arg2: memref<1x4x256xbf16, #tpu.memory_space<vmem>>, %arg3: memref<1x4x4xf32, #tpu.memory_space<vmem>>, %arg4: memref<1x4x1xf32, #tpu.memory_space<vmem>>, %arg5: memref<4x1xf32, #tpu.memory_space<vmem>>, %arg6: memref<4x1xf32, #tpu.memory_space<vmem>>, %arg7: memref<4x1xf32, #tpu.memory_space<vmem>>, %arg8: memref<4x4xf32, #tpu.memory_space<vmem>>) attributes {dimension_semantics = [#tpu.dimension_semantics<parallel>, #tpu.dimension_semantics<arbitrary>], iteration_bounds = array<i64: 2, 1>, scalar_prefetch = 0 : i64, scratch_operands = 4 : i64, tpu.core_type = #tpu.core_type<tc>, window_params = [{transform_indices = @transform_0, window_bounds = array<i64: 1, 4, 256>}, {transform_indices = @transform_1, window_bounds = array<i64: 1, 4, 4>}, {transform_indices = @transform_2, window_bounds = array<i64: 1, 4, 1>}]} {
    %c0_i32 = arith.constant 0 : i32
    %0 = arith.cmpi eq, %arg1, %c0_i32 : i32
    %1 = arith.extui %0 : i1 to i32
    %c0_i32_0 = arith.constant 0 : i32
    %2 = arith.cmpi ne, %1, %c0_i32_0 : i32
    scf.if %2 {
      %cst_25 = arith.constant 0xFF800000 : f32
      %39 = vector.broadcast %cst_25 : f32 to vector<4x1xf32>
      %c0_26 = arith.constant 0 : index
      %c0_27 = arith.constant 0 : index
      %40 = vector.load %arg5[%c0_26, %c0_27] : memref<4x1xf32, #tpu.memory_space<vmem>>, vector<4x1xf32>
      tpu.vector_store %arg5[%c0_26, %c0_27], %39 {strides = array<i32>} : memref<4x1xf32, #tpu.memory_space<vmem>>, vector<4x1xf32>,
      %cst_28 = arith.constant 0.000000e+00 : f32
      %41 = vector.broadcast %cst_28 : f32 to vector<4x1xf32>
      %c0_29 = arith.constant 0 : index
      %c0_30 = arith.constant 0 : index
      %42 = vector.load %arg6[%c0_29, %c0_30] : memref<4x1xf32, #tpu.memory_space<vmem>>, vector<4x1xf32>
      tpu.vector_store %arg6[%c0_29, %c0_30], %41 {strides = array<i32>} : memref<4x1xf32, #tpu.memory_space<vmem>>, vector<4x1xf32>,
      %cst_31 = arith.constant 0.000000e+00 : f32
      %43 = vector.broadcast %cst_31 : f32 to vector<4x1xf32>
      %c0_32 = arith.constant 0 : index
      %c0_33 = arith.constant 0 : index
      %44 = vector.load %arg7[%c0_32, %c0_33] : memref<4x1xf32, #tpu.memory_space<vmem>>, vector<4x1xf32>
      tpu.vector_store %arg7[%c0_32, %c0_33], %43 {strides = array<i32>} : memref<4x1xf32, #tpu.memory_space<vmem>>, vector<4x1xf32>,
      %cst_34 = arith.constant 0.000000e+00 : f32
      %45 = vector.broadcast %cst_34 : f32 to vector<4x4xf32>
      %c0_35 = arith.constant 0 : index
      %c0_36 = arith.constant 0 : index
      %46 = vector.load %arg8[%c0_35, %c0_36] : memref<4x4xf32, #tpu.memory_space<vmem>>, vector<4x4xf32>
      tpu.vector_store %arg8[%c0_35, %c0_36], %45 {strides = array<i32>} : memref<4x4xf32, #tpu.memory_space<vmem>>, vector<4x4xf32>,
    } else {
    }
    %c0 = arith.constant 0 : index
    %c0_1 = arith.constant 0 : index
    %c0_2 = arith.constant 0 : index
    %3 = vector.load %arg2[%c0, %c0_1, %c0_2] : memref<1x4x256xbf16, #tpu.memory_space<vmem>>, vector<1x4x256xbf16>
    %4 = vector.shape_cast %3 : vector<1x4x256xbf16> to vector<4x256xbf16>
    %5 = arith.extf %4 : vector<4x256xbf16> to vector<4x256xf32>
    %cst = arith.constant 5.000000e+00 : f32
    %6 = vector.broadcast %cst : f32 to vector<4x256xf32>
    %7 = arith.mulf %5, %6 : vector<4x256xf32>
    %c0_3 = arith.constant 0 : index
    %c0_4 = arith.constant 0 : index
    %8 = vector.load %arg5[%c0_3, %c0_4] : memref<4x1xf32, #tpu.memory_space<vmem>>, vector<4x1xf32>
    %cst_5 = arith.constant dense<0xFF800000> : vector<4xf32>
    %9 = vector.multi_reduction <maximumf>, %7, %cst_5 [1] : vector<4x256xf32> to vector<4xf32>
    %10 = vector.shape_cast %9 : vector<4xf32> to vector<4x1xf32>
    %11 = arith.maximumf %8, %10 : vector<4x1xf32>
    %12 = arith.subf %8, %11 : vector<4x1xf32>
    %13 = math.exp %12 : vector<4x1xf32>
    %14 = vector.broadcast %11 : vector<4x1xf32> to vector<4x256xf32>
    %15 = arith.subf %7, %14 : vector<4x256xf32>
    %16 = math.exp %15 : vector<4x256xf32>
    %c0_6 = arith.constant 0 : index
    %c0_7 = arith.constant 0 : index
    %17 = vector.load %arg6[%c0_6, %c0_7] : memref<4x1xf32, #tpu.memory_space<vmem>>, vector<4x1xf32>
    %18 = arith.mulf %13, %17 : vector<4x1xf32>
    %cst_8 = arith.constant dense<0.000000e+00> : vector<4xf32>
    %19 = vector.multi_reduction <add>, %16, %cst_8 [1] : vector<4x256xf32> to vector<4xf32>
    %20 = vector.shape_cast %19 : vector<4xf32> to vector<4x1xf32>
    %21 = arith.addf %18, %20 : vector<4x1xf32>
    %c0_9 = arith.constant 0 : index
    %c0_10 = arith.constant 0 : index
    %22 = vector.load %arg6[%c0_9, %c0_10] : memref<4x1xf32, #tpu.memory_space<vmem>>, vector<4x1xf32>
    tpu.vector_store %arg6[%c0_9, %c0_10], %21 {strides = array<i32>} : memref<4x1xf32, #tpu.memory_space<vmem>>, vector<4x1xf32>,
    %c0_11 = arith.constant 0 : index
    %c0_12 = arith.constant 0 : index
    %23 = vector.load %arg7[%c0_11, %c0_12] : memref<4x1xf32, #tpu.memory_space<vmem>>, vector<4x1xf32>
    %cst_13 = arith.constant dense<0.000000e+00> : vector<4xf32>
    %24 = vector.multi_reduction <add>, %5, %cst_13 [1] : vector<4x256xf32> to vector<4xf32>
    %25 = vector.shape_cast %24 : vector<4xf32> to vector<4x1xf32>
    %26 = arith.addf %23, %25 : vector<4x1xf32>
    %c0_14 = arith.constant 0 : index
    %c0_15 = arith.constant 0 : index
    %27 = vector.load %arg7[%c0_14, %c0_15] : memref<4x1xf32, #tpu.memory_space<vmem>>, vector<4x1xf32>
    tpu.vector_store %arg7[%c0_14, %c0_15], %26 {strides = array<i32>} : memref<4x1xf32, #tpu.memory_space<vmem>>, vector<4x1xf32>,
    %c0_16 = arith.constant 0 : index
    %c0_17 = arith.constant 0 : index
    %28 = vector.load %arg8[%c0_16, %c0_17] : memref<4x4xf32, #tpu.memory_space<vmem>>, vector<4x4xf32>
    %29 = vector.broadcast %13 : vector<4x1xf32> to vector<4x4xf32>
    %30 = arith.mulf %29, %28 : vector<4x4xf32>
    %31 = arith.truncf %16 : vector<4x256xf32> to vector<4x256xbf16>
    %cst_18 = arith.constant dense<0.000000e+00> : vector<4x4xf32>
    %32 = tpu.matmul %31, %4, %cst_18 {dimension_numbers = #tpu.dot_dimension_numbers<[1], [1], [0], [0], [0, 0, 1, 0], [], []>} : vector<4x256xbf16>, vector<4x256xbf16>, vector<4x4xf32> -> vector<4x4xf32>
    %33 = arith.addf %30, %32 : vector<4x4xf32>
    %c0_19 = arith.constant 0 : index
    %c0_20 = arith.constant 0 : index
    %34 = vector.load %arg8[%c0_19, %c0_20] : memref<4x4xf32, #tpu.memory_space<vmem>>, vector<4x4xf32>
    tpu.vector_store %arg8[%c0_19, %c0_20], %33 {strides = array<i32>} : memref<4x4xf32, #tpu.memory_space<vmem>>, vector<4x4xf32>,
    %c0_21 = arith.constant 0 : index
    %c0_22 = arith.constant 0 : index
    %35 = vector.load %arg5[%c0_21, %c0_22] : memref<4x1xf32, #tpu.memory_space<vmem>>, vector<4x1xf32>
    tpu.vector_store %arg5[%c0_21, %c0_22], %11 {strides = array<i32>} : memref<4x1xf32, #tpu.memory_space<vmem>>, vector<4x1xf32>,
    %c0_i32_23 = arith.constant 0 : i32
    %36 = arith.cmpi eq, %arg1, %c0_i32_23 : i32
    %37 = arith.extui %36 : i1 to i32
    %c0_i32_24 = arith.constant 0 : i32
    %38 = arith.cmpi ne, %37, %c0_i32_24 : i32
    scf.if %38 {
      %c0_25 = arith.constant 0 : index
      %c0_26 = arith.constant 0 : index
      %39 = vector.load %arg8[%c0_25, %c0_26] : memref<4x4xf32, #tpu.memory_space<vmem>>, vector<4x4xf32>
      %c0_27 = arith.constant 0 : index
      %c0_28 = arith.constant 0 : index
      %40 = vector.load %arg6[%c0_27, %c0_28] : memref<4x1xf32, #tpu.memory_space<vmem>>, vector<4x1xf32>
      %41 = vector.broadcast %40 : vector<4x1xf32> to vector<4x4xf32>
      %42 = arith.divf %39, %41 : vector<4x4xf32>
      %cst_29 = arith.constant dense<0xFF800000> : vector<4xf32>
      %43 = vector.multi_reduction <maximumf>, %42, %cst_29 [1] : vector<4x4xf32> to vector<4xf32>
      %44 = vector.shape_cast %43 : vector<4xf32> to vector<4x1xf32>
      %45 = vector.broadcast %44 : vector<4x1xf32> to vector<4x4xf32>
      %46 = arith.subf %42, %45 : vector<4x4xf32>
      %47 = math.exp %46 : vector<4x4xf32>
      %cst_30 = arith.constant dense<0.000000e+00> : vector<4xf32>
      %48 = vector.multi_reduction <add>, %47, %cst_30 [1] : vector<4x4xf32> to vector<4xf32>
      %49 = vector.shape_cast %48 : vector<4xf32> to vector<4x1xf32>
      %50 = vector.broadcast %49 : vector<4x1xf32> to vector<4x4xf32>
      %51 = arith.divf %47, %50 : vector<4x4xf32>
      %c0_31 = arith.constant 0 : index
      %c0_32 = arith.constant 0 : index
      %c0_33 = arith.constant 0 : index
      %52 = vector.load %arg3[%c0_31, %c0_32, %c0_33] : memref<1x4x4xf32, #tpu.memory_space<vmem>>, vector<1x4x4xf32>
      %53 = vector.shape_cast %52 : vector<1x4x4xf32> to vector<4x4xf32>
      %54 = vector.shape_cast %51 : vector<4x4xf32> to vector<1x4x4xf32>
      tpu.vector_store %arg3[%c0_31, %c0_32, %c0_33], %54 {strides = array<i32>} : memref<1x4x4xf32, #tpu.memory_space<vmem>>, vector<1x4x4xf32>,
      %c0_34 = arith.constant 0 : index
      %c0_35 = arith.constant 0 : index
      %55 = vector.load %arg7[%c0_34, %c0_35] : memref<4x1xf32, #tpu.memory_space<vmem>>, vector<4x1xf32>
      %cst_36 = arith.constant dense<0.000000e+00> : vector<4x1xf32>
      %56 = tpu.matmul %51, %55, %cst_36 {dimension_numbers = #tpu.dot_dimension_numbers<[1], [0], [0], [1], [0, 0, 1, 1], [], []>} : vector<4x4xf32>, vector<4x1xf32>, vector<4x1xf32> -> vector<4x1xf32>
      %c0_37 = arith.constant 0 : index
      %c0_38 = arith.constant 0 : index
      %c0_39 = arith.constant 0 : index
      %57 = vector.load %arg4[%c0_37, %c0_38, %c0_39] : memref<1x4x1xf32, #tpu.memory_space<vmem>>, vector<1x4x1xf32>
      %58 = vector.shape_cast %57 : vector<1x4x1xf32> to vector<4x1xf32>
      %59 = vector.shape_cast %56 : vector<4x1xf32> to vector<1x4x1xf32>
      tpu.vector_store %arg4[%c0_37, %c0_38, %c0_39], %59 {strides = array<i32>} : memref<1x4x1xf32, #tpu.memory_space<vmem>>, vector<1x4x1xf32>,
    } else {
    }
    return
  }
  func.func @transform_0(%arg0: i32, %arg1: i32) -> (i32, i32, i32) {
    %c0_i32 = arith.constant 0 : i32
    %c0_i32_0 = arith.constant 0 : i32
    return %arg0, %c0_i32, %arg1 : i32, i32, i32
  }
  func.func @transform_1(%arg0: i32, %arg1: i32) -> (i32, i32, i32) {
    %c0_i32 = arith.constant 0 : i32
    %c0_i32_0 = arith.constant 0 : i32
    %c0_i32_1 = arith.constant 0 : i32
    return %arg0, %c0_i32, %c0_i32_0 : i32, i32, i32
  }
  func.func @transform_2(%arg0: i32, %arg1: i32) -> (i32, i32, i32) {
    %c0_i32 = arith.constant 0 : i32
    %c0_i32_0 = arith.constant 0 : i32
    %c0_i32_1 = arith.constant 0 : i32
    return %arg0, %c0_i32, %c0_i32_0 : i32, i32, i32
  }
}

</mosaic_0001>

<bundles_post_ra>
// kernel: tpu_custom_call.1
= control target key start
LH: loop header
LB: loop body
LE: loop exit
PB: predicated region body
PF: predicated region fallthrough
CT: control target
= control target key end

     0   :  { %8 = vsyncpa [#allocation7], 0  ;;  %s959_s0 = inlined_call_operand.hbm [shape: bf16[2,4,256], index: 0, kind: input, shape index: {}]   ;;  %s960_s1 = inlined_call_operand.hbm [shape: f32[2,4,4], index: 1, kind: output, shape index: {0}]   ;;  %s961_s2 = inlined_call_operand.vmem [shape: f32[2,4,1], index: 2, kind: output, shape index: {1}]  }
   0x1   :  { %10 = vsyncpa [#allocation7 + $0x1], 0 }
   0x2   :  { %11 = vsyncpa [#allocation8], 0 }
   0x3   :  { %13 = vsyncpa [#allocation8 + $0x1], 0  ;;  %s786_s9 = smov 0   ;;  %s788_s10 = smov 0  }
   0x4   :  { %s790_s11 = smov 0   ;;  %s792_s12 = smov 0  }
   0x5   :  { %s794_s13 = smov 0   ;;  %s796_s14 = smov 0  }
   0x6 LB: > { %s548_s15 = sadd.s32 4294967295, %s761_s14   ;;  %s549_s16 = sadd.s32 4294967294, %s761_s14   ;;  %s761_s14 = sphi %s796_s14, %s19_s14   ;;  %s757_s13 = sphi %s794_s13, %s973_s13   ;;  %s753_s12 = sphi %s792_s12, %s972_s12   ;;  %s749_s11 = sphi %s790_s11, %s971_s11   ;;  %s745_s10 = sphi %s788_s10, %s970_s10   ;;  %s741_s9 = sphi %s786_s9, %s969_s9  }
   0x7   : > { %s31_s17 = sadd.s32 1, %s757_s13  ;;  %s40_s18 = sadd.s32 1, %s749_s11 }
   0x8   : > { %p33_p0 = scmp.ge.s32.totalorder %s31_s17, 2  ;;  %p47_p1 = scmp.ne.s32.totalorder %s749_s11, %s745_s10 }
   0x9   : > { %p48_p2 = scmp.eq.s32.totalorder %s761_s14, 0  ;;  %p53_p3 = scmp.ne.s32.totalorder %s745_s10, %s741_s9 }
   0xa   : > { %s975_s17 = smov (%p33_p0, %s31_s17), 0  ;;  %p54_p5 = scmp.eq.s32.totalorder %s548_s15, 0 }
   0xb   : > { %p827_p4 = por %p48_p2, %p47_p1  ;;  %s35_s20 = ssub.s32 %s757_s13, %s975_s17 }
   0xc   : > { %p77_p6 = scmp.eq.s32.totalorder %s548_s15, 1  ;;  %p38_p7 = scmp.eq.s32.totalorder %s35_s20, 0 }
   0xd   : > { %p833_p8 = por %p54_p5, %p53_p3  ;;  %p83_p10 = scmp.eq.s32.totalorder %s549_s16, 1 }
   0xe   : > { %p837_p9 = por %p77_p6, %p47_p1  ;;  %p585_p13 = scmp.lt.s32.totalorder %s761_s14, 2 }
   0xf   : > { %s842_s23 = scalar_select %p38_p7, %s749_s11, %s40_s18  }
  0x10   : > { %p844_p11 = por %p83_p10, %p53_p3  ;;  %s129_s25 = sand.u32 1, %s749_s11  }
  0x11   : > { %s552_s26 = sshll.u32 %s129_s25, 2  ;;  %s565_s27 = sshll.u32 %s757_s13, 6 }
  0x12   : > { %s965_s24 = scalar_select %p844_p11, 1, 0 }
  0x13   : > { %s141_s30 = scalar_lea.hbm %s959_s0, %s565_s27  ;;  %s133_s3 = scalar_lea.vmem [#allocation6], %s552_s26 }
  0x14   : > { %s143_s4 = sshll.u32 %s133_s3, 4  ;;  %p857_p0 = pnand %p585_p13, %p827_p4  ;;  %s144_s4 = int_to_ptr.vmem [resolvable:$true] %s143_s4 }
  0x15   : > { %p555_p1 = scmp.ge.s32.totalorder %s761_s14, 1  ;;  %p148_p2 = scmp.lt.s32.totalorder %s761_s14, 3 }
  0x16   : > { %s130_s6 = scalar_lea.sflag [#allocation7], %s129_s25  ;;  %p655_p3 = pneg %p857_p0 }
  0x17   : > { %s666_s7 = scalar_lea.vmem %s144_s4, 64  ;;  %s763_s8 = smov [#allocation6]  }
  0x18   : > { %p667_p5 = scmp.ne.s32.totalorder %s144_s4, %s666_s7  ;;  %s671_s15 = sshll.u32 %s763_s8, 4  ;;  %s672_s15 = int_to_ptr.vmem [resolvable:$false] %s671_s15 }
  0x19   : > { %s673_s16 = scalar_lea.vmem %s672_s15, 128  ;;  %p674_p10 = scmp.lt.s32.totalorder %s144_s4, %s672_s15 }
  0x1a   : > { %p669_p6 = pnand %p667_p5, %p655_p3  ;;  %p675_p12 = scmp.lt.s32.totalorder %s673_s16, %s666_s7 }
  0x1c   : > { %p670_p7 = pneg %p669_p6  ;;  %p676_p4 = por %p675_p12, %p674_p10 }
  0x1e   : > { %p677_p13 = pnand %p676_p4, %p670_p7 }
  0x20   : > { %680 = shalt.err (!%p677_p13)
}
  0x21   : > { %580 = dma.hbm_to_vmem [thread:$0]  (!%p857_p0), %s141_s30, 64, %s144_s4, %s130_s6  }
  0x22   : > { %p149_p11 = pnand %p555_p1, %p148_p2 }
  0x23   : > { %s872_s18 = sand.u32 (!%p149_p11), 1, %s745_s10  }
  0x24   : > { %152 = sbr.rel (%p149_p11) target bundleno = 1138 (0x472), region = 24  ;;  %s556_s19 = sshll.u32 (!%p149_p11), %s872_s18, 2 }
  0x25   : > { %s155_s20 = scalar_lea.sflag (!%p149_p11), [#allocation7], %s872_s18  ;;  %s158_s25 = scalar_lea.vmem (!%p149_p11), [#allocation6], %s556_s19 }
  0x29   : > { %732 = dma.done.wait (%p833_p8), %s155_s20, 64  }
  0x2a   : > { %734 = vsyncadd (%p833_p8), %s155_s20, 4294967232  ;;  %vm193_vm0 = vcmask 3072   ;;  %v764_v0 = vmov -inf   ;;  %v199_v1 = vld [vmem:[%s158_s25] sm:$0xf]  ;;  %vm206_vm1 = vcmask 1043456   ;;  %v223_v14 = vlaneseq }
  0x2b   : > { %194 = vst.msk [vmem:[#allocation2] sm:$0xf] %vm193_vm0, %v764_v0  ;;  %v883_v2 = vunpack.c.l.bf16 %v199_v1  ;;  %v765_v8 = vmov 0   ;;  %v766_v9 = vmov 0.0   ;;  %v767_v15 = vmov 1983009808  }
  0x2c   : > { %641 = vset.pattern.permute.xlu0 %v765_v8  ;;  %642 = vset.pattern.permute.xlu1 %v765_v8  ;;  %195 = vst.msk [vmem:[#allocation3] sm:$0xf] %vm193_vm0, %v766_v9  ;;  %196 = vst.msk [vmem:[#allocation4] sm:$0xf] %vm193_vm0, %v766_v9  ;;  %v266_v16 = vunpack.c.l.s4 %v767_v15  ;;  %v224_v17 = vshrl.u32 %v223_v14, 7  ;;  %vm197_vm2 = vcmask 27648  }
  0x2d   : > { %v201_v3 = vmul.f32 5.0, %v883_v2  ;;  %568 = vmatprep.subr.mxu1 %v766_v9  ;;  %v768_v22 = vmov 839922192   ;;  %198 = vst.msk [vmem:[#allocation5] sm:$0xf] %vm197_vm2, %v766_v9  ;;  %v246_v57 = vcombine.high %v883_v2, %v883_v2  ;;  %v248_v58 = vsel %vm206_vm1, %v883_v2, 0.0 }
  0x2e   : > { %v267_v18 = vunpack.c.0.s8 %v266_v16  ;;  %v221_v23 = vunpack.c.l.s4 %v768_v22  ;;  %vm769_vm3 = vmmov 0   ;;  %vm344_vm4 = vcmask 31744   ;;  %s176_s21 = scalar_lea.vmem [#allocation9], %s556_s19  ;;  %s562_s26 = sshll.u32 %s753_s12, 6 }
  0x2f   : > { %v204_v4 = vcombine.high %v201_v3, %v201_v3  ;;  %v207_v5 = vsel %vm206_vm1, %v201_v3, -inf  ;;  %v249_v59 = vsel %vm206_vm1, %v246_v57, 0.0  ;;  %570 = vmatprep.mubr.msk.f32.mxu1 %vm769_vm3, %v766_v9  ;;  %s440_s27 = sshll.u32 %s176_s21, 4  ;;  %s438_s30 = scalar_lea.hbm %s960_s1, %s562_s26  ;;  %s441_s27 = int_to_ptr.vmem [resolvable:$true] %s440_s27 }
  0x30   : > { %v270_v19 = vsub.s32 %v267_v18, %v224_v17  ;;  %v222_v24 = vunpack.c.0.s8 %v221_v23  ;;  %v250_v60 = vadd.f32 %v249_v59, %v248_v58  ;;  %s423_s3 = scalar_lea.sflag [#allocation8], %s872_s18  ;;  %s681_s4 = scalar_lea.vmem %s441_s27, 64 }
  0x31   : > { %v208_v6 = vsel %vm206_vm1, %v204_v4, -inf  ;;  %p682_p8 = scmp.ne.s32.totalorder %s441_s27, %s681_s4  ;;  %s770_s5 = smov [#allocation9]  }
  0x32   : > { %v209_v7 = vmax.f32 %v207_v5, %v208_v6  ;;  %v202_v10 = vld [vmem:[#allocation2] sm:$0xf]  ;;  %v271_v20 = vrot.slane %v199_v1, %v270_v19  ;;  %v225_v25 = vsub.s32 %v222_v24, %v224_v17  ;;  %s685_s6 = sshll.u32 %s770_s5, 4  ;;  %s686_s6 = int_to_ptr.vmem [resolvable:$false] %s685_s6 }
  0x33   : > { %v231_v39 = vld [vmem:[#allocation3] sm:$0xf]  ;;  %p683_p11 = pnand %p682_p8, %p837_p9  ;;  %s687_s7 = scalar_lea.vmem %s686_s6, 128 }
  0x34   : > { %210 = vmax.xlane.f32.xlu0 %v209_v7  ;;  %v272_v21 = vcombine.high %v271_v20, %v271_v20  ;;  %v255_v49 = vld [vmem:[#allocation5] sm:$0xf]  ;;  %p688_p0 = scmp.lt.s32.totalorder %s441_s27, %s686_s6  ;;  %p689_p1 = scmp.lt.s32.totalorder %s687_s7, %s681_s4 }
  0x35   : > { %p684_p12 = pneg %p683_p11 }
  0x36   : > { %289 = vmatprep.subr.bf16.mxu0 %v272_v21  ;;  %p690_p2 = por %p689_p1, %p688_p0 }
  0x37   : > { %290 = vmatpush1.bf16.xpose.msra.mxu0 %v271_v20 }
  0x38   : > { %p691_p3 = pnand %p690_p2, %p684_p12 }
  0xbd   : > { %v211_v11 = vpop.xlane.xlu0 %210 }
  0xbe   : > { %v212_v12 = vmax.f32 %v202_v10, %v211_v11 }
  0xc0   : > { %v213_v13 = vsub.f32 %v202_v10, %v212_v12  ;;  %318 = vst.msk [vmem:[#allocation2] sm:$0xf] %vm193_vm0, %v212_v12  ;;  %218 = vperm.xlu0 %641, %v212_v12  }
  0xc2   : > { %v214_v37 = vmul.f32 1.442695, %v213_v13 }
 0x13b   : > { %v219_v26 = vpop.permute.xlu0 %218 }
 0x13c   : > { %v226_v27 = vrot.slane %v219_v26, %v225_v25 }
 0x13e   : > { %v228_v28 = vsub.f32 %v201_v3, %v226_v27  ;;  %v244_v3 = vld [vmem:[#allocation4] sm:$0xf] }
 0x140   : > { %v229_v29 = vmul.f32 1.442695, %v228_v28 }
 0x142   : > { %643 = vpow2.f32 %v229_v29 }
 0x143   : > { %645 = vpow2.f32 %v214_v37 }
 0x14f   : > { %v644_v30 = vpop.eup %643 }
 0x150   : > { %v234_v31 = vcombine.high %v644_v30, %v644_v30  ;;  %v236_v33 = vsel %vm206_vm1, %v644_v30, 0.0  ;;  %v262_v35 = vpack.c.bf16 %v644_v30, %v644_v30  ;;  %v646_v38 = vpop.eup %645 }
 0x151   : > { %v232_v40 = vmul.f32 %v646_v38, %v231_v39 }
 0x152   : > { %v263_v32 = vpack.c.bf16 %v234_v31, %v234_v31  ;;  %v237_v34 = vsel %vm206_vm1, %v234_v31, 0.0 }
 0x153   : > { %v238_v36 = vadd.f32 %v237_v34, %v236_v33 }
 0x154   : > { %307 = vmatprep.mubr.bf16.mxu0 %v263_v32 }
 0x155   : > { %308 = vmatmul.mubr.bf16.vlgmr.msra.gmra.mxu0 %v262_v35  ;;  %239 = vadd.xlane.f32.xlu1 %v238_v36 }
 0x1de   : > { %v240_v41 = vpop.xlane.xlu1 %239 }
 0x1df   : > { %v241_v42 = vadd.f32 %v240_v41, %v232_v40 }
 0x1e1   : > { %243 = vst.msk [vmem:[#allocation3] sm:$0xf] %vm193_vm0, %v241_v42 }
 0x1e8   : > { %v323_v43 = vld [vmem:[#allocation3] sm:$0xf] }
 0x1e9   : > { %326 = vperm.xlu1 %642, %v323_v43  }
 0x1ed   : > { %258 = vperm.xlu1 %642, %v646_v38  }
 0x215   : > { %v309_v44 = vpop.f32.mrf.mxu0 }
 0x217   : > { %v311_v45 = vpop.f32.mrf.mxu0 }
 0x219   : > { %v312_v46 = vpop.f32.mrf.mxu0 }
 0x21b   : > { %v313_v47 = vpop.f32.mrf.mxu0 }
 0x264   : > { %v327_v48 = vpop.permute.xlu1 %326 }
 0x265   : > { %647 = vrcp.f32 %v327_v48 }
 0x268   : > { %v259_v50 = vpop.permute.xlu1 %258 }
 0x269   : > { %v261_v51 = vmul.f32 %v259_v50, %v255_v49 }
 0x26b   : > { %v315_v52 = vadd.f32 %v309_v44, %v261_v51 }
 0x26d   : > { %317 = vst.msk [vmem:[#allocation5] sm:$0xf] %vm197_vm2, %v315_v52 }
 0x272   : > { %v648_v53 = vpop.eup %647 }
 0x274   : > { %v322_v54 = vld [vmem:[#allocation5] sm:$0xf] }
 0x275   : > { %v330_v55 = vmul.f32 %v648_v53, %v322_v54 }
 0x277   : > { %v331_v56 = vsel %vm197_vm2, %v330_v55, -inf }
 0x278   : > { %332 = vmax.xlane.f32.xlu1 %v331_v56 }
 0x27c   : > { %251 = vadd.xlane.f32.xlu1 %v250_v60 }
 0x301   : > { %v333_v61 = vpop.xlane.xlu1 %332 }
 0x302   : > { %v334_v62 = vsub.f32 %v330_v55, %v333_v61 }
 0x304   : > { %v335_v63 = vmul.f32 1.442695, %v334_v62 }
 0x305   : > { %v252_v4 = vpop.xlane.xlu1 %251 }
 0x306   : > { %649 = vpow2.f32 %v335_v63  ;;  %v253_v2 = vadd.f32 %v252_v4, %v244_v3 }
 0x308   : > { %254 = vst.msk [vmem:[#allocation4] sm:$0xf] %vm193_vm0, %v253_v2 }
 0x30f   : > { %v343_v5 = vld [vmem:[#allocation4] sm:$0xf] }
 0x310   : > { %569 = vmatpush3.msk.msra.mxu1 %vm206_vm1, %v343_v5 }
 0x313   : > { %v650_v0 = vpop.eup %649 }
 0x314   : > { %v337_v1 = vsel %vm197_vm2, %v650_v0, 0.0 }
 0x315   : > { %338 = vadd.xlane.f32.xlu0 %v337_v1 }
 0x39e   : > { %v339_v6 = vpop.xlane.xlu0 %338 }
 0x39f   : > { %651 = vrcp.f32 %v339_v6 }
 0x3ac   : > { %v652_v7 = vpop.eup %651 }
 0x3ad   : > { %v341_v8 = vmul.f32 %v652_v7, %v650_v0 }
 0x3af   : > { %571 = vmatmul.mubr.msk.f32.vlgmr.msra.gmra.mxu1 %vm344_vm4, %v341_v8  ;;  %342 = vst.msk [vmem:[%s176_s21] sm:$0xf] %vm197_vm2, %v341_v8 }
 0x3b0   : > { %694 = shalt.err (!%p691_p3)
}
 0x3b1   : > { %s695_s8 = scalar_lea.hbm %s438_s30, 64  ;;  %s699_s18 = scalar_lea.hbm %s960_s1, 128 }
 0x3b2   : > { %p696_p5 = scmp.ne.s32.totalorder %s438_s30, %s695_s8  ;;  %p700_p10 = scmp.lt.s32.totalorder %s438_s30, %s960_s1 }
 0x3b3   : > { %p701_p4 = scmp.lt.s32.totalorder %s699_s18, %s695_s8 }
 0x3b4   : > { %p697_p6 = pnand %p696_p5, %p837_p9 }
 0x3b5   : > { %p702_p13 = por %p701_p4, %p700_p10 }
 0x3b6   : > { %p698_p7 = pneg %p697_p6 }
 0x3b8   : > { %p703_p8 = pnand %p702_p13, %p698_p7 }
 0x3ba   : > { %706 = shalt.err (!%p703_p8)
}
 0x3bb   : > { %575 = dma.vmem_to_hbm [thread:$0]  (%p837_p9), %s441_s27, 64, %s438_s30, %s423_s3  }
 0x3bc   : > { %p184_p11 = scmp.lt.s32.totalorder %s753_s12, 1 }
 0x3be   : > { %s977_s12 = smov (!%p184_p11, %s753_s12), 1 }
 0x3bf   : > { %s558_s25 = sshll.u32 %s977_s12, 2 }
 0x3c0   : > { %s187_s28 = scalar_lea.vmem %s961_s2, %s558_s25 }
 0x46f   : > { %v417_v9 = vpop.f32.mrf.mxu1 }
 0x470   : > { %421 = vst.msk [vmem:[%s187_s28] sm:$0xf] %vm193_vm0, %v417_v9 }
 0x471   : > { %v572_v10 = vpop.f32.mrf.mxu1 }
 0x472 PF: > { %s455_s29 = sand.u32 1, %s741_s9   ;;  %p967_p12 = scmp.ne.s32.totalorder %s965_s24, 0 }
 0x473   : > { %p968_p0 = scmp.ge.s32.totalorder %s761_s14, 2  ;;  %s456_s22 = scalar_lea.sflag [#allocation8], %s455_s29 }
 0x475   : > { %p582_p1 = pnand %p968_p0, %p967_p12 }
 0x477   : > { %p583_p9 = pneg %p582_p1 }
 0x479   : > { %736 = dma.done.wait (%p583_p9), %s456_s22, 64  }
 0x47a   : > { %738 = vsyncadd (%p583_p9), %s456_s22, 4294967232  ;;  %s19_s14 = sadd.s32 1, %s761_s14   ;;  %s969_s9 = smov %s745_s10 }
 0x47b   : > { %p16_p2 = scmp.ge.s32.totalorder %s19_s14, 4   ;;  %s970_s10 = smov %s749_s11 }
 0x47c   : > { %s971_s11 = smov %s842_s23  ;;  %s972_s12 = smov %s757_s13 }
 0x47d   : > { %s973_s13 = smov %s975_s17  ;;  %18 = sbr.rel (!%p16_p2) target bundleno = 6 (0x6), region = 89 }
 0x482   :  { %468 = vsyncpa [#allocation7], 1 }
 0x483   :  { %470 = vsyncpa [#allocation7 + $0x1], 1 }
 0x484   :  { %471 = vsyncpa [#allocation8], 1 }
 0x485   :  { %473 = vsyncpa [#allocation8 + $0x1], 1 }

</bundles_post_ra>
